<compile_context>
chip_gen: v7x
topology: tpu7x:2x2x1
jax: 0.10.0
libtpu: 0.0.40
codegen_flags: <defaults>
</compile_context>

<pallas_src>
import jax
import jax.numpy as jnp
from jax.experimental import pallas as pl
from jax.experimental.pallas import tpu as pltpu


def _tagging_kernel(x_ref, w1_ref, b1_ref, w2_ref, b2_ref, wl_ref, bl_ref,
                    out_ref, stack1_ref, stack2_ref):
    bblk, s, e = x_ref.shape
    m = bblk * s

    # Flatten the batch tile into the sublane axis -> (M, E) slab, kept f32
    # so the sublane rolls below are cheap single-sublane rotates.
    x = x_ref[...].reshape(m, e)

    # Row masks marking sentence boundaries inside the flattened slab.
    rows = jax.lax.broadcasted_iota(jnp.int32, (m, 1), 0)
    pos = rows % s
    first_row = pos == 0            # t == 0   -> no x[t-1] (conv zero pad)
    last_row = pos == (s - 1)       # t == S-1 -> no x[t+1]

    def fill_stack(stack_ref, a):
        # a: (M, C) f32.  stack_ref: (M, 3C) bf16 VMEM scratch holding
        # [a[t-1], a[t], a[t+1]] along lanes, boundary rows zeroed so
        # sentences in the slab do not leak into each other.
        c = a.shape[-1]
        prev = jnp.where(first_row, 0.0, pltpu.roll(a, shift=1, axis=0))
        nxt = jnp.where(last_row, 0.0, pltpu.roll(a, shift=m - 1, axis=0))
        stack_ref[:, 0:c] = prev.astype(jnp.bfloat16)
        stack_ref[:, c:2 * c] = a.astype(jnp.bfloat16)
        stack_ref[:, 2 * c:3 * c] = nxt.astype(jnp.bfloat16)

    # ---- Conv1d(E -> H, k=3, pad=1): single (M,3E)@(3E,H) contraction ----
    fill_stack(stack1_ref, x)
    h = jnp.dot(stack1_ref[...], w1_ref[...],
                preferred_element_type=jnp.float32) + b1_ref[...]
    h = jnp.maximum(h, 0.0)                                    # ReLU, (M, H) f32

    # ---- Conv1d(H -> E, k=3, pad=1): single (M,3H)@(3H,E) contraction ----
    fill_stack(stack2_ref, h)
    y = jnp.dot(stack2_ref[...], w2_ref[...],
                preferred_element_type=jnp.float32) + b2_ref[...]
    y = jnp.tanh(y).astype(jnp.bfloat16)                       # (M, E)

    # ---- Linear(E -> Tpad), tag dim pre-padded to a lane multiple ----
    out = jnp.dot(y, wl_ref[...],
                  preferred_element_type=jnp.float32) + bl_ref[...]
    out_ref[...] = out.reshape(bblk, s, -1).astype(out_ref.dtype)


def _round_up(x, m):
    return ((x + m - 1) // m) * m


def _choose_block_b(batch, seq, target_rows=2048, min_steps=2):
    """Batch tile dividing B: ~target_rows slab rows/step, grid >= min_steps.

    target_rows ~2048 amortizes the ~0.35us per-grid-step overhead while
    keeping the activation tile comfortably inside v7x's 64 MiB VMEM;
    min_steps=2 keeps >=2 grid steps so the "parallel" axis can shard across
    v7x's two TensorCores.
    """
    cap = max(1, target_rows // max(seq, 1))
    if batch >= min_steps:
        cap = min(cap, batch // min_steps)
    bblk = max(1, min(batch, cap))
    while batch % bblk:
        bblk -= 1
    return bblk


def sentence_cnn_tagging_forward(doc, params):
    """doc: (B, S, E) float32. Returns (B, S, num_tags) float32."""
    B, S, E = doc.shape
    w1, b1, w2, b2, wl, bl = (params["w1"], params["b1"], params["w2"],
                              params["b2"], params["wl"], params["bl"])
    H = w1.shape[2]
    T = wl.shape[1]
    Tpad = _round_up(T, 128)
    assert E % 128 == 0 and H % 128 == 0, "pad emb/hidden dims to 128 lanes"

    # Tap-fused conv weights: (3, Cin, Cout) -> (3*Cin, Cout); bf16 operands.
    w1s = w1.reshape(3 * E, H).astype(jnp.bfloat16)
    w2s = w2.reshape(3 * H, E).astype(jnp.bfloat16)
    # Lane-dense (zero-padded) classifier head.
    wlp = jnp.pad(wl.astype(jnp.bfloat16), ((0, 0), (0, Tpad - T)))
    blp = jnp.pad(bl, ((0, 0), (0, Tpad - T)))

    Bblk = _choose_block_b(B, S)
    grid = (B // Bblk,)
    M = Bblk * S

    flops = 2 * B * S * (3 * E * H + 3 * H * E + E * Tpad)
    bytes_accessed = (doc.size * 4 + B * S * Tpad * 2
                      + (w1s.size + w2s.size + wlp.size) * 2
                      + (b1.size + b2.size + blp.size) * 4)
    cost = pl.CostEstimate(flops=flops, transcendentals=B * S * E,
                           bytes_accessed=bytes_accessed)

    grid_spec = pltpu.PrefetchScalarGridSpec(
        num_scalar_prefetch=0,
        grid=grid,
        in_specs=[
            pl.BlockSpec((Bblk, S, E), lambda b: (b, 0, 0)),   # doc tile
            pl.BlockSpec((3 * E, H), lambda b: (0, 0)),        # conv1 weight
            pl.BlockSpec((1, H), lambda b: (0, 0)),            # conv1 bias
            pl.BlockSpec((3 * H, E), lambda b: (0, 0)),        # conv2 weight
            pl.BlockSpec((1, E), lambda b: (0, 0)),            # conv2 bias
            pl.BlockSpec((E, Tpad), lambda b: (0, 0)),         # linear weight
            pl.BlockSpec((1, Tpad), lambda b: (0, 0)),         # linear bias
        ],
        out_specs=pl.BlockSpec((Bblk, S, Tpad), lambda b: (b, 0, 0)),
        scratch_shapes=[
            pltpu.VMEM((M, 3 * E), jnp.bfloat16),              # conv1 tap stack
            pltpu.VMEM((M, 3 * H), jnp.bfloat16),              # conv2 tap stack
        ],
    )

    out_padded = pl.pallas_call(
        _tagging_kernel,
        out_shape=jax.ShapeDtypeStruct((B, S, Tpad), jnp.bfloat16),
        grid_spec=grid_spec,
        compiler_params=pltpu.CompilerParams(
            dimension_semantics=("parallel",),
            vmem_limit_bytes=48 * 1024 * 1024),
        cost_estimate=cost,
    )(doc, w1s, b1, w2s, b2, wlp, blp)

    # Lane-dense bf16 writeback inside the kernel; slice + upcast here.
    return out_padded[..., :T].astype(jnp.float32)


def init_params(key, emb_size, num_tags, hidden=256):
    """Deterministic synthetic parameters (same math as the nn.Module).
    Conv weights stored tap-major as (kernel_tap, in_ch, out_ch); real PyTorch
    Conv1d weights (Cout, Cin, K) must be transposed via .permute(2, 1, 0).
    Linear weight stored as (in, out)."""
    ks = jax.random.split(key, 6)
    scale = 0.05
    w1 = scale * jax.random.normal(ks[0], (3, emb_size, hidden), jnp.float32)
    b1 = scale * jax.random.normal(ks[1], (1, hidden), jnp.float32)
    w2 = scale * jax.random.normal(ks[2], (3, hidden, emb_size), jnp.float32)
    b2 = scale * jax.random.normal(ks[3], (1, emb_size), jnp.float32)
    wl = scale * jax.random.normal(ks[4], (emb_size, num_tags), jnp.float32)
    bl = scale * jax.random.normal(ks[5], (1, num_tags), jnp.float32)
    # TODO(synk): GRU parameters of the original module are never used in
    # forward(), so they are intentionally not materialized here.
    return dict(w1=w1, b1=b1, w2=w2, b2=b2, wl=wl, bl=bl)


def reference_forward_f32(doc, params):
    """Pure-JAX f32 reference matching PyTorch semantics (channel-last)."""
    def conv1d(x, w, b):  # x (B,S,Cin), w (3,Cin,Cout)
        xp = jnp.pad(x, ((0, 0), (1, 1), (0, 0)))
        y = (jnp.einsum("bsc,cd->bsd", xp[:, :-2], w[0])
             + jnp.einsum("bsc,cd->bsd", xp[:, 1:-1], w[1])
             + jnp.einsum("bsc,cd->bsd", xp[:, 2:], w[2]))
        return y + b
    h = jax.nn.relu(conv1d(doc, params["w1"], params["b1"]))
    y = jnp.tanh(conv1d(h, params["w2"], params["b2"]))
    return jnp.einsum("bse,et->bst", y, params["wl"]) + params["bl"]


def reference_forward_bf16(doc, params):
    """Pure-JAX reference mirroring the kernel's bf16 matmul operands."""
    bf = jnp.bfloat16
    def conv1d(x, w, b):
        xp = jnp.pad(x, ((0, 0), (1, 1), (0, 0)))
        xs = jnp.concatenate([xp[:, :-2], xp[:, 1:-1], xp[:, 2:]],
                             axis=-1).astype(bf)
        ws = w.reshape(-1, w.shape[-1]).astype(bf)
        return jnp.einsum("bsc,cd->bsd", xs, ws,
                          preferred_element_type=jnp.float32) + b
    h = jax.nn.relu(conv1d(doc, params["w1"], params["b1"]))
    y = jnp.tanh(conv1d(h, params["w2"], params["b2"]))
    return (jnp.einsum("bse,et->bst", y.astype(bf), params["wl"].astype(bf),
                       preferred_element_type=jnp.float32) + params["bl"])


if __name__ == "__main__":
    # Small shapes consistent with the module (emb/hidden scaled down).
    B, S, E, NUM_TAGS = 2, 16, 128, 20

    key = jax.random.PRNGKey(0)
    k_doc, k_par = jax.random.split(key)
    doc = jax.random.normal(k_doc, (B, S, E), jnp.float32)
    params = init_params(k_par, E, NUM_TAGS)

    out = jax.block_until_ready(sentence_cnn_tagging_forward(doc, params))
    assert out.shape == (B, S, NUM_TAGS)

    ref_bf16 = reference_forward_bf16(doc, params)
    ref_f32 = reference_forward_f32(doc, params)
    assert jnp.allclose(out, ref_bf16, atol=2e-2, rtol=2e-2), \
        float(jnp.max(jnp.abs(out - ref_bf16)))
    assert jnp.allclose(out, ref_f32, atol=5e-2, rtol=5e-2), \
        float(jnp.max(jnp.abs(out - ref_f32)))

    print("KERNEL_OK")
</pallas_src>

<mosaic_0001>
module attributes {stable_mosaic.version = 11 : i64} {
  func.func @_tagging_kernel(%arg0: i32, %arg1: memref<1x16x128xf32, #tpu.memory_space<vmem>>, %arg2: memref<384x256xbf16, #tpu.memory_space<vmem>>, %arg3: memref<1x256xf32, #tpu.memory_space<vmem>>, %arg4: memref<768x128xbf16, #tpu.memory_space<vmem>>, %arg5: memref<1x128xf32, #tpu.memory_space<vmem>>, %arg6: memref<128x128xbf16, #tpu.memory_space<vmem>>, %arg7: memref<1x128xf32, #tpu.memory_space<vmem>>, %arg8: memref<1x16x128xbf16, #tpu.memory_space<vmem>>, %arg9: memref<16x384xbf16, #tpu.memory_space<vmem>>, %arg10: memref<16x768xbf16, #tpu.memory_space<vmem>>) attributes {dimension_semantics = [#tpu.dimension_semantics<parallel>], iteration_bounds = array<i64: 2>, scalar_prefetch = 0 : i64, scratch_operands = 2 : i64, tpu.core_type = #tpu.core_type<tc>, window_params = [{transform_indices = @transform_0, window_bounds = array<i64: 1, 16, 128>}, {pipeline_mode = #tpu.pipeline_mode<synchronous>, transform_indices = @transform_1, window_bounds = array<i64: 384, 256>}, {pipeline_mode = #tpu.pipeline_mode<synchronous>, transform_indices = @transform_2, window_bounds = array<i64: 1, 256>}, {pipeline_mode = #tpu.pipeline_mode<synchronous>, transform_indices = @transform_3, window_bounds = array<i64: 768, 128>}, {pipeline_mode = #tpu.pipeline_mode<synchronous>, transform_indices = @transform_4, window_bounds = array<i64: 1, 128>}, {pipeline_mode = #tpu.pipeline_mode<synchronous>, transform_indices = @transform_5, window_bounds = array<i64: 128, 128>}, {pipeline_mode = #tpu.pipeline_mode<synchronous>, transform_indices = @transform_6, window_bounds = array<i64: 1, 128>}, {transform_indices = @transform_7, window_bounds = array<i64: 1, 16, 128>}]} {
    %c0 = arith.constant 0 : index
    %c0_0 = arith.constant 0 : index
    %c0_1 = arith.constant 0 : index
    %0 = vector.load %arg1[%c0, %c0_0, %c0_1] : memref<1x16x128xf32, #tpu.memory_space<vmem>>, vector<1x16x128xf32>
    %1 = vector.shape_cast %0 : vector<1x16x128xf32> to vector<16x128xf32>
    %2 = tpu.iota {dimensions = array<i32: 0>} : vector<16x1xi32>
    %c16_i32 = arith.constant 16 : i32
    %c0_i32 = arith.constant 0 : i32
    %3 = arith.cmpi eq, %c16_i32, %c0_i32 : i32
    %c1_i32 = arith.constant 1 : i32
    %4 = arith.select %3, %c1_i32, %c16_i32 : i32
    %5 = vector.broadcast %4 : i32 to vector<16x1xi32>
    %6 = arith.remsi %2, %5 : vector<16x1xi32>
    %c0_i32_2 = arith.constant 0 : i32
    %7 = vector.broadcast %c0_i32_2 : i32 to vector<16x1xi32>
    %8 = arith.cmpi ne, %6, %7 : vector<16x1xi32>
    %c0_i32_3 = arith.constant 0 : i32
    %9 = vector.broadcast %c0_i32_3 : i32 to vector<16x1xi32>
    %10 = arith.cmpi slt, %6, %9 : vector<16x1xi32>
    %c0_i32_4 = arith.constant 0 : i32
    %11 = arith.cmpi slt, %4, %c0_i32_4 : i32
    %12 = vector.broadcast %11 : i1 to vector<16x1xi1>
    %13 = vector.broadcast %12 : vector<16x1xi1> to vector<16x1xi1>
    %14 = arith.xori %10, %13 : vector<16x1xi1>
    %15 = arith.andi %14, %8 : vector<16x1xi1>
    %16 = vector.broadcast %4 : i32 to vector<16x1xi32>
    %17 = arith.addi %6, %16 : vector<16x1xi32>
    %18 = arith.select %15, %17, %6 : vector<16x1xi1>, vector<16x1xi32>
    %c0_i32_5 = arith.constant 0 : i32
    %19 = vector.broadcast %c0_i32_5 : i32 to vector<16x1xi32>
    %20 = arith.cmpi eq, %18, %19 : vector<16x1xi32>
    %c15_i32 = arith.constant 15 : i32
    %21 = vector.broadcast %c15_i32 : i32 to vector<16x1xi32>
    %22 = arith.cmpi eq, %18, %21 : vector<16x1xi32>
    %c1_i32_6 = arith.constant 1 : i32
    %23 = tpu.dynamic_rotate %1 by %c1_i32_6 dim 0 : vector<16x128xf32>, i32 -> vector<16x128xf32>
    %cst = arith.constant 0.000000e+00 : f32
    %24 = vector.shape_cast %20 : vector<16x1xi1> to vector<16x1xi1>
    %25 = vector.broadcast %24 : vector<16x1xi1> to vector<16x128xi1>
    %26 = vector.broadcast %cst : f32 to vector<16x128xf32>
    %27 = arith.select %25, %26, %23 : vector<16x128xi1>, vector<16x128xf32>
    %c15_i32_7 = arith.constant 15 : i32
    %28 = tpu.dynamic_rotate %1 by %c15_i32_7 dim 0 : vector<16x128xf32>, i32 -> vector<16x128xf32>
    %cst_8 = arith.constant 0.000000e+00 : f32
    %29 = vector.shape_cast %22 : vector<16x1xi1> to vector<16x1xi1>
    %30 = vector.broadcast %29 : vector<16x1xi1> to vector<16x128xi1>
    %31 = vector.broadcast %cst_8 : f32 to vector<16x128xf32>
    %32 = arith.select %30, %31, %28 : vector<16x128xi1>, vector<16x128xf32>
    %33 = arith.truncf %27 : vector<16x128xf32> to vector<16x128xbf16>
    %c0_9 = arith.constant 0 : index
    %c0_10 = arith.constant 0 : index
    %34 = vector.load %arg9[%c0_9, %c0_10] : memref<16x384xbf16, #tpu.memory_space<vmem>>, vector<16x128xbf16>
    tpu.vector_store %arg9[%c0_9, %c0_10], %33 {strides = array<i32>} : memref<16x384xbf16, #tpu.memory_space<vmem>>, vector<16x128xbf16>,
    %35 = arith.truncf %1 : vector<16x128xf32> to vector<16x128xbf16>
    %c0_11 = arith.constant 0 : index
    %c128 = arith.constant 128 : index
    %36 = vector.load %arg9[%c0_11, %c128] : memref<16x384xbf16, #tpu.memory_space<vmem>>, vector<16x128xbf16>
    tpu.vector_store %arg9[%c0_11, %c128], %35 {strides = array<i32>} : memref<16x384xbf16, #tpu.memory_space<vmem>>, vector<16x128xbf16>,
    %37 = arith.truncf %32 : vector<16x128xf32> to vector<16x128xbf16>
    %c0_12 = arith.constant 0 : index
    %c256 = arith.constant 256 : index
    %38 = vector.load %arg9[%c0_12, %c256] : memref<16x384xbf16, #tpu.memory_space<vmem>>, vector<16x128xbf16>
    tpu.vector_store %arg9[%c0_12, %c256], %37 {strides = array<i32>} : memref<16x384xbf16, #tpu.memory_space<vmem>>, vector<16x128xbf16>,
    %c0_13 = arith.constant 0 : index
    %c0_14 = arith.constant 0 : index
    %39 = vector.load %arg9[%c0_13, %c0_14] : memref<16x384xbf16, #tpu.memory_space<vmem>>, vector<16x384xbf16>
    %c0_15 = arith.constant 0 : index
    %c0_16 = arith.constant 0 : index
    %40 = vector.load %arg2[%c0_15, %c0_16] : memref<384x256xbf16, #tpu.memory_space<vmem>>, vector<384x256xbf16>
    %cst_17 = arith.constant dense<0.000000e+00> : vector<16x256xf32>
    %41 = tpu.matmul %39, %40, %cst_17 {dimension_numbers = #tpu.dot_dimension_numbers<[1], [0], [0], [1], [0, 0, 1, 1], [], []>} : vector<16x384xbf16>, vector<384x256xbf16>, vector<16x256xf32> -> vector<16x256xf32>
    %c0_18 = arith.constant 0 : index
    %c0_19 = arith.constant 0 : index
    %42 = vector.load %arg3[%c0_18, %c0_19] : memref<1x256xf32, #tpu.memory_space<vmem>>, vector<1x256xf32>
    %43 = vector.broadcast %42 : vector<1x256xf32> to vector<16x256xf32>
    %44 = arith.addf %41, %43 : vector<16x256xf32>
    %cst_20 = arith.constant 0.000000e+00 : f32
    %45 = vector.broadcast %cst_20 : f32 to vector<16x256xf32>
    %46 = arith.maximumf %44, %45 : vector<16x256xf32>
    %c1_i32_21 = arith.constant 1 : i32
    %47 = tpu.dynamic_rotate %46 by %c1_i32_21 dim 0 : vector<16x256xf32>, i32 -> vector<16x256xf32>
    %cst_22 = arith.constant 0.000000e+00 : f32
    %48 = vector.shape_cast %20 : vector<16x1xi1> to vector<16x1xi1>
    %49 = vector.broadcast %48 : vector<16x1xi1> to vector<16x256xi1>
    %50 = vector.broadcast %cst_22 : f32 to vector<16x256xf32>
    %51 = arith.select %49, %50, %47 : vector<16x256xi1>, vector<16x256xf32>
    %c15_i32_23 = arith.constant 15 : i32
    %52 = tpu.dynamic_rotate %46 by %c15_i32_23 dim 0 : vector<16x256xf32>, i32 -> vector<16x256xf32>
    %cst_24 = arith.constant 0.000000e+00 : f32
    %53 = vector.shape_cast %22 : vector<16x1xi1> to vector<16x1xi1>
    %54 = vector.broadcast %53 : vector<16x1xi1> to vector<16x256xi1>
    %55 = vector.broadcast %cst_24 : f32 to vector<16x256xf32>
    %56 = arith.select %54, %55, %52 : vector<16x256xi1>, vector<16x256xf32>
    %57 = arith.truncf %51 : vector<16x256xf32> to vector<16x256xbf16>
    %c0_25 = arith.constant 0 : index
    %c0_26 = arith.constant 0 : index
    %58 = vector.load %arg10[%c0_25, %c0_26] : memref<16x768xbf16, #tpu.memory_space<vmem>>, vector<16x256xbf16>
    tpu.vector_store %arg10[%c0_25, %c0_26], %57 {strides = array<i32>} : memref<16x768xbf16, #tpu.memory_space<vmem>>, vector<16x256xbf16>,
    %59 = arith.truncf %46 : vector<16x256xf32> to vector<16x256xbf16>
    %c0_27 = arith.constant 0 : index
    %c256_28 = arith.constant 256 : index
    %60 = vector.load %arg10[%c0_27, %c256_28] : memref<16x768xbf16, #tpu.memory_space<vmem>>, vector<16x256xbf16>
    tpu.vector_store %arg10[%c0_27, %c256_28], %59 {strides = array<i32>} : memref<16x768xbf16, #tpu.memory_space<vmem>>, vector<16x256xbf16>,
    %61 = arith.truncf %56 : vector<16x256xf32> to vector<16x256xbf16>
    %c0_29 = arith.constant 0 : index
    %c512 = arith.constant 512 : index
    %62 = vector.load %arg10[%c0_29, %c512] : memref<16x768xbf16, #tpu.memory_space<vmem>>, vector<16x256xbf16>
    tpu.vector_store %arg10[%c0_29, %c512], %61 {strides = array<i32>} : memref<16x768xbf16, #tpu.memory_space<vmem>>, vector<16x256xbf16>,
    %c0_30 = arith.constant 0 : index
    %c0_31 = arith.constant 0 : index
    %63 = vector.load %arg10[%c0_30, %c0_31] : memref<16x768xbf16, #tpu.memory_space<vmem>>, vector<16x768xbf16>
    %c0_32 = arith.constant 0 : index
    %c0_33 = arith.constant 0 : index
    %64 = vector.load %arg4[%c0_32, %c0_33] : memref<768x128xbf16, #tpu.memory_space<vmem>>, vector<768x128xbf16>
    %cst_34 = arith.constant dense<0.000000e+00> : vector<16x128xf32>
    %65 = tpu.matmul %63, %64, %cst_34 {dimension_numbers = #tpu.dot_dimension_numbers<[1], [0], [0], [1], [0, 0, 1, 1], [], []>} : vector<16x768xbf16>, vector<768x128xbf16>, vector<16x128xf32> -> vector<16x128xf32>
    %c0_35 = arith.constant 0 : index
    %c0_36 = arith.constant 0 : index
    %66 = vector.load %arg5[%c0_35, %c0_36] : memref<1x128xf32, #tpu.memory_space<vmem>>, vector<1x128xf32>
    %67 = vector.broadcast %66 : vector<1x128xf32> to vector<16x128xf32>
    %68 = arith.addf %65, %67 : vector<16x128xf32>
    %69 = math.tanh %68 : vector<16x128xf32>
    %70 = arith.truncf %69 : vector<16x128xf32> to vector<16x128xbf16>
    %c0_37 = arith.constant 0 : index
    %c0_38 = arith.constant 0 : index
    %71 = vector.load %arg6[%c0_37, %c0_38] : memref<128x128xbf16, #tpu.memory_space<vmem>>, vector<128x128xbf16>
    %cst_39 = arith.constant dense<0.000000e+00> : vector<16x128xf32>
    %72 = tpu.matmul %70, %71, %cst_39 {dimension_numbers = #tpu.dot_dimension_numbers<[1], [0], [0], [1], [0, 0, 1, 1], [], []>} : vector<16x128xbf16>, vector<128x128xbf16>, vector<16x128xf32> -> vector<16x128xf32>
    %c0_40 = arith.constant 0 : index
    %c0_41 = arith.constant 0 : index
    %73 = vector.load %arg7[%c0_40, %c0_41] : memref<1x128xf32, #tpu.memory_space<vmem>>, vector<1x128xf32>
    %74 = vector.broadcast %73 : vector<1x128xf32> to vector<16x128xf32>
    %75 = arith.addf %72, %74 : vector<16x128xf32>
    %76 = vector.shape_cast %75 : vector<16x128xf32> to vector<1x16x128xf32>
    %77 = arith.truncf %76 : vector<1x16x128xf32> to vector<1x16x128xbf16>
    %c0_42 = arith.constant 0 : index
    %c0_43 = arith.constant 0 : index
    %c0_44 = arith.constant 0 : index
    %78 = vector.load %arg8[%c0_42, %c0_43, %c0_44] : memref<1x16x128xbf16, #tpu.memory_space<vmem>>, vector<1x16x128xbf16>
    tpu.vector_store %arg8[%c0_42, %c0_43, %c0_44], %77 {strides = array<i32>} : memref<1x16x128xbf16, #tpu.memory_space<vmem>>, vector<1x16x128xbf16>,
    return
  }
  func.func @transform_0(%arg0: i32) -> (i32, i32, i32) {
    %c0_i32 = arith.constant 0 : i32
    %c0_i32_0 = arith.constant 0 : i32
    %c0_i32_1 = arith.constant 0 : i32
    return %arg0, %c0_i32, %c0_i32_0 : i32, i32, i32
  }
  func.func @transform_1(%arg0: i32) -> (i32, i32) {
    %c0_i32 = arith.constant 0 : i32
    %c0_i32_0 = arith.constant 0 : i32
    %c0_i32_1 = arith.constant 0 : i32
    return %c0_i32, %c0_i32_0 : i32, i32
  }
  func.func @transform_2(%arg0: i32) -> (i32, i32) {
    %c0_i32 = arith.constant 0 : i32
    %c0_i32_0 = arith.constant 0 : i32
    %c0_i32_1 = arith.constant 0 : i32
    return %c0_i32, %c0_i32_0 : i32, i32
  }
  func.func @transform_3(%arg0: i32) -> (i32, i32) {
    %c0_i32 = arith.constant 0 : i32
    %c0_i32_0 = arith.constant 0 : i32
    %c0_i32_1 = arith.constant 0 : i32
    return %c0_i32, %c0_i32_0 : i32, i32
  }
  func.func @transform_4(%arg0: i32) -> (i32, i32) {
    %c0_i32 = arith.constant 0 : i32
    %c0_i32_0 = arith.constant 0 : i32
    %c0_i32_1 = arith.constant 0 : i32
    return %c0_i32, %c0_i32_0 : i32, i32
  }
  func.func @transform_5(%arg0: i32) -> (i32, i32) {
    %c0_i32 = arith.constant 0 : i32
    %c0_i32_0 = arith.constant 0 : i32
    %c0_i32_1 = arith.constant 0 : i32
    return %c0_i32, %c0_i32_0 : i32, i32
  }
  func.func @transform_6(%arg0: i32) -> (i32, i32) {
    %c0_i32 = arith.constant 0 : i32
    %c0_i32_0 = arith.constant 0 : i32
    %c0_i32_1 = arith.constant 0 : i32
    return %c0_i32, %c0_i32_0 : i32, i32
  }
  func.func @transform_7(%arg0: i32) -> (i32, i32, i32) {
    %c0_i32 = arith.constant 0 : i32
    %c0_i32_0 = arith.constant 0 : i32
    %c0_i32_1 = arith.constant 0 : i32
    return %arg0, %c0_i32, %c0_i32_0 : i32, i32, i32
  }
}

</mosaic_0001>

<bundles_post_ra>
// kernel: tpu_custom_call.1
= control target key start
LH: loop header
LB: loop body
LE: loop exit
PB: predicated region body
PF: predicated region fallthrough
CT: control target
= control target key end

     0   :  { %s2699_s0 = inlined_call_operand.hbm [shape: f32[2,16,128], index: 0, kind: input, shape index: {}]   ;;  %s2700_s1 = inlined_call_operand.hbm [shape: bf16[384,256], index: 1, kind: input, shape index: {}]   ;;  %s2701_s2 = inlined_call_operand.vmem [shape: f32[1,256], index: 2, kind: input, shape index: {}]   ;;  %s2702_s3 = inlined_call_operand.hbm [shape: bf16[768,128], index: 3, kind: input, shape index: {}]   ;;  %s2703_s4 = inlined_call_operand.vmem [shape: f32[1,128], index: 4, kind: input, shape index: {}]   ;;  %s2704_s5 = inlined_call_operand.hbm [shape: bf16[128,128], index: 5, kind: input, shape index: {}]   ;;  %s2705_s6 = inlined_call_operand.vmem [shape: f32[1,128], index: 6, kind: input, shape index: {}]   ;;  %s2706_s7 = inlined_call_operand.hbm [shape: bf16[2,16,128], index: 7, kind: output, shape index: {}]  }
   0x1   :  { %2713 = sst [smem:[#allocation18_spill]] %s2700_s1 }
   0x2   :  { %12 = vsyncpa [#allocation5], 0 }
   0x3   :  { %14 = vsyncpa [#allocation5 + $0x1], 0 }
   0x4   :  { %15 = vsyncpa [#allocation8], 0 }
   0x5   :  { %16 = vsyncpa [#allocation11], 0 }
   0x6   :  { %17 = vsyncpa [#allocation6], 0 }
   0x7   :  { %19 = vsyncpa [#allocation6 + $0x1], 0  ;;  %s2323_s24 = smov 0   ;;  %s2325_s25 = smov 0  }
   0x8   :  { %s2327_s26 = smov 0   ;;  %s2329_s27 = smov 0  }
   0x9 LB: > { %s2344_s28 = sadd.s32 4294967295, %s2266_s27   ;;  %s1593_s29 = sadd.s32 4294967294, %s2266_s27   ;;  %s2266_s27 = sphi %s2329_s27, %s2744_s27   ;;  %s2262_s26 = sphi %s2327_s26, %s2743_s26   ;;  %s2258_s25 = sphi %s2325_s25, %s2742_s25   ;;  %s2254_s24 = sphi %s2323_s24, %s2741_s24  }
   0xa   : > { %p45_p0 = scmp.ne.s32.totalorder %s2258_s25, %s2254_s24  ;;  %p2707_p1 = scmp.eq.s32.totalorder %s2344_s28, 0 }
   0xb   : > { %p201_p3 = scmp.eq.s32.totalorder %s1593_s29, 1  ;;  %p1594_p5 = scmp.ge.s32.totalorder %s2266_s27, 1 }
   0xc   : > { %p2353_p4 = por %p2707_p1, %p45_p0  ;;  %p208_p7 = scmp.lt.s32.totalorder %s2266_s27, 3 }
   0xd   : > { %p2358_p6 = por %p201_p3, %p45_p0  ;;  %s2268_s10 = smov [#allocation7]  }
   0xe   : > { %s2714_s30 = scalar_select %p2353_p4, 1, 0 }
   0xf   : > { %s2715_s8 = scalar_select %p2358_p6, 1, 0 }
  0x10   : > { %p2363_p8 = pnand %p1594_p5, %p208_p7  ;;  %s220_s11 = sshll.u32 %s2268_s10, 4  ;;  %s2367_s11 = int_to_ptr.vmem [resolvable:$true] %s220_s11 }
  0x11   : > { %2716 = sst [smem:[#allocation17_spill]] %s2715_s8  ;;  %s2269_s13 = smov [#allocation9]  }
  0x12   : > { %s2717_s9 = scalar_select %p2363_p8, 1, 0 }
  0x13   : > { %p1873_p9 = pneg %p2363_p8  ;;  %s236_s14 = sshll.u32 %s2269_s13, 4  ;;  %s2378_s14 = int_to_ptr.vmem [resolvable:$true] %s236_s14 }
  0x14   : > { %s2719_s1 = sld [smem:[#allocation18_spill]] }
  0x15   : > { %p2374_p11 = pnand %p1873_p9, %p2707_p1 }
  0x17   : > { %p2388_p13 = pneg %p2374_p11 }
  0x1a   : > { %s2078_s17 = scalar_lea.hbm %s2719_s1, 6144 }
  0x1b   : > { %p2079_p12 = scmp.ne.s32.totalorder %s2719_s1, %s2078_s17  ;;  %p2085_p5 = scmp.lt.u32.totalorder %s2078_s17, %s2719_s1 }
  0x1d   : > { %p2081_p0 = pnand %p2388_p13, %p2079_p12 }
  0x1f   : > { %p2082_p3 = pneg %p2081_p0 }
  0x21   : > { %p2087_p7 = pnand %p2085_p5, %p2082_p3 }
  0x23   : > { %2090 = shalt.err (!%p2087_p7)
}
  0x24   : > { %s2091_s23 = scalar_lea.vmem %s2367_s11, 6144  ;;  %p2099_p2 = scmp.lt.s32.totalorder %s2367_s11, %s2367_s11 }
  0x25   : > { %p2092_p9 = scmp.ne.s32.totalorder %s2367_s11, %s2091_s23  ;;  %p2100_p6 = scmp.lt.s32.totalorder %s2091_s23, %s2091_s23 }
  0x27   : > { %p2094_p10 = pnand %p2092_p9, %p2388_p13  ;;  %p2101_p12 = por %p2100_p6, %p2099_p2 }
  0x29   : > { %p2095_p1 = pneg %p2094_p10 }
  0x2b   : > { %p2102_p0 = pnand %p2101_p12, %p2095_p1 }
  0x2d   : > { %2105 = shalt.err (!%p2102_p0)
}
  0x2e   : > { %s2708_s29 = smov 128   ;;  %s2709_s10 = smov 8  }
  0x2f   : > { %1876 = dma.hbm_to_vmem [thread:$0]  (!%p2374_p11), %s2719_s1, 6144, %s2367_s11, [#allocation8], %s2708_s29, %s2708_s29, %s2709_s10  }
  0x30   : > { %s2106_s18 = scalar_lea.hbm %s2702_s3, 6144 }
  0x31   : > { %p2107_p1 = scmp.ne.s32.totalorder %s2702_s3, %s2106_s18  ;;  %p2113_p10 = scmp.lt.u32.totalorder %s2106_s18, %s2702_s3 }
  0x33   : > { %p2109_p2 = pnand %p2107_p1, %p2388_p13 }
  0x35   : > { %p2110_p6 = pneg %p2109_p2 }
  0x37   : > { %p2115_p3 = pnand %p2113_p10, %p2110_p6 }
  0x39   : > { %2118 = shalt.err (!%p2115_p3)
}
  0x3a   : > { %s2119_s11 = scalar_lea.vmem %s2378_s14, 6144  ;;  %p2127_p12 = scmp.lt.s32.totalorder %s2378_s14, %s2378_s14 }
  0x3b   : > { %p2120_p5 = scmp.ne.s32.totalorder %s2378_s14, %s2119_s11  ;;  %p2128_p0 = scmp.lt.s32.totalorder %s2119_s11, %s2119_s11 }
  0x3d   : > { %p2122_p7 = pnand %p2120_p5, %p2388_p13  ;;  %p2129_p1 = por %p2128_p0, %p2127_p12 }
  0x3f   : > { %p2123_p9 = pneg %p2122_p7 }
  0x41   : > { %p2130_p2 = pnand %p2129_p1, %p2123_p9 }
  0x43   : > { %2133 = shalt.err (!%p2130_p2)
}
  0x44   : > { %s2272_s13 = smov 64   ;;  %s2273_s15 = smov 4  }
  0x45   : > { %1879 = dma.hbm_to_vmem [thread:$0]  (!%p2374_p11), %s2702_s3, 6144, %s2378_s14, [#allocation8], %s2272_s13, %s2272_s13, %s2273_s15  }
  0x46   : > { %s2274_s18 = smov [#allocation10]   ;;  %s2436_s21 = sadd.s32 1, %s2266_s27  }
  0x47   : > { %s252_s19 = sshll.u32 %s2274_s18, 4  ;;  %s2134_s11 = scalar_lea.hbm %s2704_s5, 1024  ;;  %s253_s19 = int_to_ptr.vmem [resolvable:$true] %s252_s19 }
  0x48   : > { %p2135_p6 = scmp.ne.s32.totalorder %s2704_s5, %s2134_s11  ;;  %p2141_p5 = scmp.lt.u32.totalorder %s2134_s11, %s2704_s5 }
  0x4a   : > { %p2137_p10 = pnand %p2135_p6, %p2388_p13 }
  0x4c   : > { %p2138_p3 = pneg %p2137_p10 }
  0x4e   : > { %p2143_p7 = pnand %p2141_p5, %p2138_p3 }
  0x50   : > { %2146 = shalt.err (!%p2143_p7)
}
  0x51   : > { %s2147_s14 = scalar_lea.vmem %s253_s19, 1024  ;;  %p2155_p1 = scmp.lt.s32.totalorder %s253_s19, %s253_s19 }
  0x52   : > { %p2148_p9 = scmp.ne.s32.totalorder %s253_s19, %s2147_s14  ;;  %p2156_p2 = scmp.lt.s32.totalorder %s2147_s14, %s2147_s14 }
  0x54   : > { %p2150_p12 = pnand %p2148_p9, %p2388_p13  ;;  %p2157_p4 = por %p2156_p2, %p2155_p1 }
  0x56   : > { %p2151_p0 = pneg %p2150_p12 }
  0x58   : > { %p2158_p8 = pnand %p2157_p4, %p2151_p0 }
  0x5a   : > { %2161 = shalt.err (!%p2158_p8)
}
  0x5b   : > { %1882 = dma.hbm_to_vmem [thread:$0]  (!%p2374_p11), %s2704_s5, 1024, %s253_s19, [#allocation11], %s2272_s13, %s2272_s13, %s2273_s15  }
  0x5c   : > { %s29_s1 = ssub.s32 %s2266_s27, %s2436_s21  ;;  %s32_s8 = sadd.s32 1, %s2262_s26 }
  0x5d   : > { %p30_p4 = scmp.eq.s32.totalorder %s29_s1, 0  ;;  %p39_p8 = scmp.ne.s32.totalorder %s2262_s26, %s2258_s25 }
  0x5e   : > { %p40_p13 = scmp.eq.s32.totalorder %s2266_s27, 0  ;;  %p1894_p6 = scmp.lt.s32.totalorder %s2266_s27, 2 }
  0x5f   : > { %s2464_s12 = scalar_select %p30_p4, %s2262_s26, %s32_s8  }
  0x60   : > { %p41_p10 = por %p40_p13, %p39_p8  ;;  %p2721_p3 = scmp.eq.s32.totalorder %s2344_s28, 1 }
  0x61   : > { %s269_s16 = sand.u32 1, %s2262_s26   ;;  %s1721_s17 = sshll.u32 %s2266_s27, 8 }
  0x62   : > { %p2468_p5 = por %p2721_p3, %p39_p8  ;;  %s1599_s18 = sshll.u32 %s269_s16, 4 }
  0x63   : > { %s2477_s13 = scalar_lea.hbm %s2699_s0, %s1721_s17  ;;  %s273_s15 = scalar_lea.vmem [#allocation4], %s1599_s18 }
  0x64   : > { %s280_s19 = sshll.u32 %s273_s15, 4  ;;  %p2479_p11 = pnand %p1894_p6, %p41_p10  ;;  %s2483_s19 = int_to_ptr.vmem [resolvable:$true] %s280_s19 }
  0x65   : > { %s2485_s14 = scalar_lea.sflag [#allocation5], %s269_s16  ;;  %s2162_s29 = scalar_lea.hbm %s2477_s13, 256 }
  0x66   : > { %p2163_p7 = scmp.ne.s32.totalorder %s2477_s13, %s2162_s29  ;;  %p2164_p9 = pneg %p2479_p11 }
  0x67   : > { %s2167_s8 = scalar_lea.hbm %s2699_s0, 512  ;;  %p2168_p1 = scmp.lt.u32.totalorder %s2477_s13, %s2699_s0 }
  0x68   : > { %p2165_p12 = pnand %p2164_p9, %p2163_p7  ;;  %p2169_p2 = scmp.lt.u32.totalorder %s2167_s8, %s2162_s29 }
  0x69   : > { %p2171_p8 = scmp.lt.u32.totalorder %s2162_s29, %s2477_s13 }
  0x6a   : > { %p2166_p0 = pneg %p2165_p12  ;;  %p2170_p4 = por %p2169_p2, %p2168_p1 }
  0x6c   : > { %p2172_p13 = por %p2171_p8, %p2170_p4 }
  0x6e   : > { %p2173_p6 = pnand %p2172_p13, %p2166_p0 }
  0x70   : > { %2176 = shalt.err (!%p2173_p6)
}
  0x71   : > { %s2177_s16 = scalar_lea.vmem %s2483_s19, 256  ;;  %s2275_s22 = smov [#allocation4]  }
  0x72   : > { %p2178_p10 = scmp.ne.s32.totalorder %s2483_s19, %s2177_s16  ;;  %s2182_s23 = sshll.u32 %s2275_s22, 4  ;;  %s2183_s23 = int_to_ptr.vmem [resolvable:$false] %s2182_s23 }
  0x73   : > { %s2184_s15 = scalar_lea.vmem %s2183_s23, 512  ;;  %p2185_p12 = scmp.lt.s32.totalorder %s2483_s19, %s2183_s23 }
  0x74   : > { %p2180_p3 = pnand %p2178_p10, %p2164_p9  ;;  %p2186_p1 = scmp.lt.s32.totalorder %s2184_s15, %s2177_s16 }
  0x76   : > { %p2181_p7 = pneg %p2180_p3  ;;  %p2187_p2 = por %p2186_p1, %p2185_p12 }
  0x78   : > { %p2188_p4 = pnand %p2187_p2, %p2181_p7 }
  0x7a   : > { %2191 = shalt.err (!%p2188_p4)
}
  0x7b   : > { %s2724_s29 = smov 8   ;;  %s2725_s10 = smov 128  }
  0x7c   : > { %1886 = dma.hbm_to_vmem [thread:$0]  (!%p2479_p11), %s2477_s13, 256, %s2483_s19, %s2485_s14, %s2725_s10, %s2725_s10, %s2724_s29  }
  0x7d   : > { %p2726_p9 = scmp.ne.s32.totalorder %s2717_s9, 0 }
  0x7e   : > { %s2519_s1 = sand.u32 (!%p2726_p9), 1, %s2258_s25   ;;  %p2727_p0 = scmp.ne.s32.totalorder (!%p2726_p9), %s2714_s30, 0 }
  0x7f   : > { %292 = sbr.rel (%p2726_p9) target bundleno = 993 (0x3e1), region = 48  ;;  %s1603_s8 = sshll.u32 (!%p2726_p9), %s2519_s1, 4 }
  0x80   : > { %s295_s17 = scalar_lea.sflag (!%p2726_p9), [#allocation5], %s2519_s1  ;;  %s2523_s18 = scalar_lea.vmem (!%p2726_p9), [#allocation4], %s1603_s8 }
  0x86   : > { %2237 = dma.done.wait (%p2727_p0), %s295_s17, 256  }
  0x87   : > { %2239 = vsyncadd (%p2727_p0), %s295_s17, 4294967040  ;;  %p2728_p11 = scmp.eq.s32.totalorder %s2344_s28, 0 }
  0x89   : > { %2241 = dma.done.wait (%p2728_p11), [#allocation8], 12288   ;;  %p2729_p8 = pmov %p2728_p11 }
  0x8b   : > { %2243 = vsyncadd (%p2729_p8), [#allocation8], 4294955008  ;;  %p2730_p13 = pmov %p2729_p8 }
  0x8c   : > { %p2731_p6 = pmov %p2729_p8 }
  0x8d   : > { %2245 = dma.done.wait (%p2730_p13), [#allocation11], 1024  }
  0x8e   : > { %2247 = vsyncadd (%p2731_p6), [#allocation11], 4294966272  ;;  %v344_v0 = vlaneseq  ;;  %v1946_v5 = vld [vmem:[#allocation7 + $0x4] ss:$8 sps:$4 sm:$0xff]   ;;  %v1948_v6 = vld [vmem:[#allocation7] ss:$8 sps:$4 sm:$0xff]  }
  0x8f   : > { %706 = vmatprep.subr.bf16.mxu0 %v1946_v5  ;;  %v1949_v7 = vld [vmem:[#allocation7 + $0x14] ss:$8 sps:$4 sm:$0xff]   ;;  %v1951_v8 = vld [vmem:[#allocation7 + $0x10] ss:$8 sps:$4 sm:$0xff]   ;;  %v1952_v9 = vld [vmem:[#allocation7 + $0x24] ss:$8 sps:$4 sm:$0xff]  }
  0x90   : > { %v2537_v1 = vshrl.u32 %v344_v0, 7  ;;  %707 = vmatpush1.bf16.msra.mxu0 %v1948_v6  ;;  %v1954_v10 = vld [vmem:[#allocation7 + $0x20] ss:$8 sps:$4 sm:$0xff]   ;;  %v1955_v11 = vld [vmem:[#allocation7 + $0x34] ss:$8 sps:$4 sm:$0xff]   ;;  %vm2276_vm3 = vmmov 1  }
  0x91   : > { %708 = vmatprep.subr.bf16.mxu0 %v1949_v7  ;;  %v1957_v12 = vld [vmem:[#allocation7 + $0x30] ss:$8 sps:$4 sm:$0xff]   ;;  %v1958_v13 = vld [vmem:[#allocation7 + $0x44] ss:$8 sps:$4 sm:$0xff]   ;;  %v1960_v14 = vld [vmem:[#allocation7 + $0x40] ss:$8 sps:$4 sm:$0xff]  }
  0x92   : > { %v2540_v2 = vadd.s32 8, %v2537_v1  ;;  %v351_v3 = vand.u32 15, %v2537_v1  ;;  %v1961_v15 = vld [vmem:[#allocation7 + $0x54] ss:$8 sps:$4 sm:$0xff]   ;;  %v1963_v16 = vld [vmem:[#allocation7 + $0x50] ss:$8 sps:$4 sm:$0xff]  }
  0x93   : > { %v1964_v17 = vld [vmem:[#allocation7 + $0x64] ss:$8 sps:$4 sm:$0xff]   ;;  %vm388_vm0 = vcmp.lt.s32.totalorder %v2537_v1, 7  ;;  %v1966_v22 = vld [vmem:[#allocation7 + $0x60] ss:$8 sps:$4 sm:$0xff]   ;;  %v2022_v38 = vld [vmem:[#allocation9 + $0x50] sm:$0xff]  }
  0x94   : > { %v358_v4 = vand.u32 15, %v2540_v2  ;;  %709 = vmatpush1.bf16.msra.mxu0 %v1951_v8  ;;  %v2545_v18 = vld [vmem:[%s2523_s18] sm:$0xff]  ;;  %v2548_v19 = vld [vmem:[%s2523_s18 + $0x8] sm:$0xff]  ;;  %vm2569_vm1 = vcmp.ne.s32.totalorder %v351_v3, 0  ;;  %vm377_vm2 = vcmp.lt.s32.totalorder %v2537_v1, 1  ;;  %v2277_v6 = vmov 0  }
  0x95   : > { %710 = vmatprep.subr.bf16.mxu0 %v1952_v9  ;;  %v386_v20 = vrot.slane %v2545_v18, 1  ;;  %v387_v21 = vrot.slane %v2548_v19, 1  ;;  %v399_v23 = vpack.c.bf16 %v2548_v19, %v2545_v18  ;;  %v1967_v24 = vld [vmem:[#allocation7 + $0x74] ss:$8 sps:$4 sm:$0xff]   ;;  %v1969_v28 = vld [vmem:[#allocation7 + $0x70] ss:$8 sps:$4 sm:$0xff]   ;;  %vm2577_vm4 = vmpackc.low %vm2276_vm3, %vm2569_vm1 }
  0x96   : > { %v1970_v29 = vld [vmem:[#allocation7 + $0x84] ss:$8 sps:$4 sm:$0xff]   ;;  %v1972_v30 = vld [vmem:[#allocation7 + $0x80] ss:$8 sps:$4 sm:$0xff]   ;;  %v1973_v31 = vld [vmem:[#allocation7 + $0x94] ss:$8 sps:$4 sm:$0xff]  }
  0x97   : > { %v2557_v25 = vsel %vm388_vm0, %v386_v20, %v387_v21  ;;  %v2561_v26 = vsel %vm388_vm0, %v387_v21, %v386_v20  ;;  %738 = vmatprep.mubr.bf16.mxu0 %v399_v23  ;;  %v1975_v32 = vld [vmem:[#allocation7 + $0x90] ss:$8 sps:$4 sm:$0xff]   ;;  %v1976_v33 = vld [vmem:[#allocation7 + $0xa4] ss:$8 sps:$4 sm:$0xff]   ;;  %v1978_v39 = vld [vmem:[#allocation7 + $0xa0] ss:$8 sps:$4 sm:$0xff]  }
  0x98   : > { %711 = vmatpush1.bf16.msra.mxu0 %v1954_v10  ;;  %v1736_v27 = vpack.c.bf16 %v2561_v26, %v2557_v25  ;;  %v2018_v34 = vld [vmem:[#allocation9 + $0x40] sm:$0xff]   ;;  %v2020_v36 = vld [vmem:[#allocation9 + $0x48] sm:$0xff]   ;;  %v1979_v40 = vld [vmem:[#allocation7 + $0xb4] ss:$8 sps:$4 sm:$0xff]   ;;  %v375_v45 = vrot.slane %v2545_v18, 7  ;;  %v376_v46 = vrot.slane %v2548_v19, 7 }
  0x99   : > { %712 = vmatprep.subr.bf16.mxu0 %v1955_v11  ;;  %v2019_v35 = vld [vmem:[#allocation9] sm:$0xff]   ;;  %1754 = vmatprep.subr.bf16.mxu1 %v2018_v34  ;;  %v2021_v37 = vld [vmem:[#allocation9 + $0x8] sm:$0xff]   ;;  %v1981_v41 = vld [vmem:[#allocation7 + $0xb0] ss:$8 sps:$4 sm:$0xff]   ;;  %vm1899_vm5 = vcmp.ne.s32.totalorder %v358_v4, 15  ;;  %v462_v26 = vsub.s32 1, %v2537_v1 }
  0x9a   : > { %1755 = vmatpush3.bf16.msra.mxu1 %v2019_v35  ;;  %v2023_v42 = vld [vmem:[#allocation9 + $0x10] sm:$0xff]   ;;  %v1982_v43 = vld [vmem:[#allocation7 + $0xc4] ss:$8 sps:$4 sm:$0xff]   ;;  %v2024_v44 = vld [vmem:[#allocation9 + $0x58] sm:$0xff]   ;;  %v378_v60 = vsel %vm377_vm2, %v375_v45, %v376_v46  ;;  %v379_v61 = vsel %vm377_vm2, %v376_v46, %v375_v45  ;;  %vm2279_vm7 = vmmov 0   ;;  %s1607_s11 = sshll.u32 %s2519_s1, 3 }
  0x9b   : > { %1756 = vmatprep.subr.bf16.mxu1 %v2020_v36  ;;  %v2025_v47 = vld [vmem:[#allocation9 + $0x18] sm:$0xff]   ;;  %v2026_v49 = vld [vmem:[#allocation9 + $0x60] sm:$0xff]   ;;  %v1732_v63 = vpack.c.bf16 %v378_v60, %v379_v61  ;;  %vm2590_vm6 = vmpackc.low %vm1899_vm5, %vm2276_vm3  ;;  %s340_s22 = scalar_lea.vmem [#allocation12], %s1607_s11  ;;  %s1724_s15 = sshll.u32 %s2344_s28, 7 }
  0x9c   : > { %713 = vmatpush1.bf16.msra.mxu0 %v1957_v12  ;;  %v1984_v50 = vld [vmem:[#allocation7 + $0xc0] ss:$8 sps:$4 sm:$0xff]   ;;  %v1985_v51 = vld [vmem:[#allocation7 + $0xd4] ss:$8 sps:$4 sm:$0xff]   ;;  %v1987_v53 = vld [vmem:[#allocation7 + $0xd0] ss:$8 sps:$4 sm:$0xff]   ;;  %s2655_s8 = scalar_lea.hbm %s2706_s7, %s1724_s15 }
  0x9d   : > { %714 = vmatprep.subr.bf16.mxu0 %v1958_v13  ;;  %v2027_v52 = vld [vmem:[#allocation9 + $0x20] sm:$0xff]   ;;  %v1991_v56 = vld [vmem:[#allocation7 + $0xf4] ss:$8 sps:$4 sm:$0xff]   ;;  %v1993_v58 = vld [vmem:[#allocation7 + $0xf0] ss:$8 sps:$4 sm:$0xff]   ;;  %s1491_s23 = sshll.u32 %s340_s22, 4  ;;  %s2650_s23 = int_to_ptr.vmem [resolvable:$true] %s1491_s23 }
  0x9e   : > { %1757 = vmatpush3.bf16.msra.mxu1 %v2021_v37  ;;  %v1988_v54 = vld [vmem:[#allocation7 + $0xe4] ss:$8 sps:$4 sm:$0xff]   ;;  %v1990_v55 = vld [vmem:[#allocation7 + $0xe0] ss:$8 sps:$4 sm:$0xff]   ;;  %v1999_v0 = vld [vmem:[#allocation7 + $0x114] ss:$8 sps:$4 sm:$0xff]  }
  0x9f   : > { %1758 = vmatprep.subr.bf16.mxu1 %v2022_v38  ;;  %v1996_v59 = vld [vmem:[#allocation7 + $0x104] ss:$8 sps:$4 sm:$0xff]   ;;  %v1994_v62 = vld [vmem:[#allocation7 + $0x100] ss:$8 sps:$4 sm:$0xff]   ;;  %v1997_v3 = vld [vmem:[#allocation7 + $0x110] ss:$8 sps:$4 sm:$0xff]  }
  0xa0   : > { %715 = vmatpush1.bf16.msra.mxu0 %v1960_v14  ;;  %v2002_v5 = vld [vmem:[#allocation7 + $0x124] ss:$8 sps:$4 sm:$0xff]   ;;  %v2000_v7 = vld [vmem:[#allocation7 + $0x120] ss:$8 sps:$4 sm:$0xff]   ;;  %v2005_v8 = vld [vmem:[#allocation7 + $0x134] ss:$8 sps:$4 sm:$0xff]  }
  0xa1   : > { %716 = vmatprep.subr.bf16.mxu0 %v1961_v15  ;;  %v2003_v9 = vld [vmem:[#allocation7 + $0x130] ss:$8 sps:$4 sm:$0xff]   ;;  %v2008_v10 = vld [vmem:[#allocation7 + $0x144] ss:$8 sps:$4 sm:$0xff]   ;;  %v2006_v11 = vld [vmem:[#allocation7 + $0x140] ss:$8 sps:$4 sm:$0xff]  }
  0xa2   : > { %1759 = vmatpush3.bf16.msra.mxu1 %v2023_v42  ;;  %v2011_v12 = vld [vmem:[#allocation7 + $0x154] ss:$8 sps:$4 sm:$0xff]   ;;  %v2009_v13 = vld [vmem:[#allocation7 + $0x150] ss:$8 sps:$4 sm:$0xff]   ;;  %v2014_v14 = vld [vmem:[#allocation7 + $0x164] ss:$8 sps:$4 sm:$0xff]  }
  0xa3   : > { %1760 = vmatprep.subr.bf16.mxu1 %v2024_v44  ;;  %v2012_v15 = vld [vmem:[#allocation7 + $0x160] ss:$8 sps:$4 sm:$0xff]   ;;  %v2030_v21 = vld [vmem:[#allocation9 + $0x70] sm:$0xff]   ;;  %v2032_v4 = vld [vmem:[#allocation9 + $0x78] sm:$0xff]   ;;  %s1478_s17 = scalar_lea.sflag [#allocation6], %s2519_s1  ;;  %s2192_s18 = scalar_lea.vmem %s2650_s23, 128 }
  0xa4   : > { %717 = vmatpush1.bf16.msra.mxu0 %v1963_v16  ;;  %v2017_v16 = vld [vmem:[#allocation7 + $0x174] ss:$8 sps:$4 sm:$0xff]   ;;  %v2028_v19 = vld [vmem:[#allocation9 + $0x68] sm:$0xff]   ;;  %v2034_v23 = vld [vmem:[#allocation9 + $0xc0] sm:$0xff]   ;;  %p2193_p10 = scmp.ne.s32.totalorder %s2650_s23, %s2192_s18  ;;  %s2280_s28 = smov [#allocation12]  }
  0xa5   : > { %718 = vmatprep.subr.bf16.mxu0 %v1964_v17  ;;  %v2015_v17 = vld [vmem:[#allocation7 + $0x170] ss:$8 sps:$4 sm:$0xff]   ;;  %v2029_v20 = vld [vmem:[#allocation9 + $0x28] sm:$0xff]   ;;  %v454_v25 = vld [vmem:[%s2701_s2] sm:$0x3]  ;;  %s2196_s30 = sshll.u32 %s2280_s28, 4  ;;  %s2197_s30 = int_to_ptr.vmem [resolvable:$false] %s2196_s30 }
  0xa6   : > { %1761 = vmatpush3.bf16.msra.mxu1 %v2025_v47  ;;  %v2031_v2 = vld [vmem:[#allocation9 + $0x30] sm:$0xff]   ;;  %v2035_v61 = vld [vmem:[#allocation9 + $0x80] sm:$0xff]   ;;  %v2045_v57 = vld [vmem:[#allocation9 + $0xa8] sm:$0xff]   ;;  %p2194_p3 = pnand %p2193_p10, %p2468_p5  ;;  %s2198_s9 = scalar_lea.vmem %s2197_s30, 256 }
  0xa7   : > { %1762 = vmatprep.subr.bf16.mxu1 %v2026_v49  ;;  %v2072_v18 = vld [vmem:[#allocation10 + $0x30] sm:$0xff]   ;;  %p2199_p12 = scmp.lt.s32.totalorder %s2650_s23, %s2197_s30  ;;  %p2200_p1 = scmp.lt.s32.totalorder %s2198_s9, %s2192_s18 }
  0xa8   : > { %719 = vmatpush1.bf16.msra.mxu0 %v1966_v22  ;;  %v2033_v22 = vld [vmem:[#allocation9 + $0x38] sm:$0xff]   ;;  %p2195_p7 = pneg %p2194_p3 }
  0xa9   : > { %720 = vmatprep.subr.bf16.mxu0 %v1967_v24  ;;  %v458_v24 = vsub.s32 0, %v2537_v1  ;;  %v2041_v1 = vld [vmem:[#allocation9 + $0x98] sm:$0xff]   ;;  %p2201_p2 = por %p2200_p1, %p2199_p12 }
  0xaa   : > { %1763 = vmatpush3.bf16.msra.mxu1 %v2027_v52 }
  0xab   : > { %1764 = vmatprep.subr.bf16.mxu1 %v2028_v19  ;;  %v2052_v19 = vld [vmem:[#allocation9 + $0x148] sm:$0xff]   ;;  %p2202_p4 = pnand %p2201_p2, %p2195_p7 }
  0xac   : > { %721 = vmatpush1.bf16.msra.mxu0 %v1969_v28  ;;  %v463_v28 = vrot.slane %v454_v25, %v462_v26  ;;  %v2061_v26 = vld [vmem:[#allocation9 + $0x128] sm:$0xff]  }
  0xad   : > { %722 = vmatprep.subr.bf16.mxu0 %v1970_v29 }
  0xae   : > { %1765 = vmatpush3.bf16.msra.mxu1 %v2029_v20  ;;  %v2053_v20 = vld [vmem:[#allocation9 + $0x108] sm:$0xff]  }
  0xaf   : > { %1766 = vmatprep.subr.bf16.mxu1 %v2030_v21  ;;  %v2054_v21 = vld [vmem:[#allocation9 + $0x150] sm:$0xff]  }
  0xb0   : > { %723 = vmatpush1.bf16.msra.mxu0 %v1972_v30 }
  0xb1   : > { %724 = vmatprep.subr.bf16.mxu0 %v1973_v31 }
  0xb2   : > { %1767 = vmatpush3.bf16.msra.mxu1 %v2031_v2  ;;  %v2055_v2 = vld [vmem:[#allocation9 + $0x110] sm:$0xff]  }
  0xb3   : > { %1768 = vmatprep.subr.bf16.mxu1 %v2032_v4  ;;  %v2056_v4 = vld [vmem:[#allocation9 + $0x158] sm:$0xff]  }
  0xb4   : > { %725 = vmatpush1.bf16.msra.mxu0 %v1975_v32 }
  0xb5   : > { %726 = vmatprep.subr.bf16.mxu0 %v1976_v33 }
  0xb6   : > { %1769 = vmatpush3.bf16.msra.mxu1 %v2033_v22  ;;  %v2057_v22 = vld [vmem:[#allocation9 + $0x118] sm:$0xff]  }
  0xb7   : > { %1776 = vmatprep.subr.bf16.mxu1 %v2034_v23  ;;  %v2058_v23 = vld [vmem:[#allocation9 + $0x160] sm:$0xff]  }
  0xb8   : > { %727 = vmatpush1.bf16.msra.mxu0 %v1978_v39 }
  0xb9   : > { %728 = vmatprep.subr.bf16.mxu0 %v1979_v40 }
  0xbc   : > { %729 = vmatpush1.bf16.msra.mxu0 %v1981_v41 }
  0xbd   : > { %730 = vmatprep.subr.bf16.mxu0 %v1982_v43 }
  0xc0   : > { %731 = vmatpush1.bf16.msra.mxu0 %v1984_v50 }
  0xc1   : > { %732 = vmatprep.subr.bf16.mxu0 %v1985_v51 }
  0xc4   : > { %733 = vmatpush1.bf16.msra.mxu0 %v1987_v53 }
  0xc5   : > { %734 = vmatprep.subr.bf16.mxu0 %v1988_v54 }
  0xc8   : > { %735 = vmatpush1.bf16.msra.mxu0 %v1990_v55 }
  0xc9   : > { %736 = vmatprep.subr.bf16.mxu0 %v1991_v56 }
  0xcc   : > { %737 = vmatpush1.bf16.msra.mxu0 %v1993_v58 }
  0xcd   : > { %749 = vmatprep.subr.bf16.mxu0 %v1996_v59 }
  0xcf   : > { %1733 = vmatmul.mubr.msk.bf16.vlgmr.msra.gmra.mrb[0].mxu0 %vm2577_vm4, %v1732_v63 }
  0xd0   : > { %750 = vmatpush1.bf16.msra.mxu0 %v1994_v62  ;;  %781 = vmatprep.mubr.bf16.mxu0 %v2277_v6  ;;  %v2038_v6 = vld [vmem:[#allocation9 + $0xd0] sm:$0xff]  }
  0xd1   : > { %751 = vmatprep.subr.bf16.mxu0 %v1999_v0  ;;  %v2036_v0 = vld [vmem:[#allocation9 + $0xc8] sm:$0xff]  }
  0xd4   : > { %752 = vmatpush1.bf16.msra.mxu0 %v1997_v3 }
  0xd5   : > { %753 = vmatprep.subr.bf16.mxu0 %v2002_v5  ;;  %v2037_v5 = vld [vmem:[#allocation9 + $0x88] sm:$0xff]  }
  0xd8   : > { %754 = vmatpush1.bf16.msra.mxu0 %v2000_v7  ;;  %v2039_v7 = vld [vmem:[#allocation9 + $0x90] sm:$0xff]  }
  0xd9   : > { %755 = vmatprep.subr.bf16.mxu0 %v2005_v8  ;;  %v2040_v8 = vld [vmem:[#allocation9 + $0xd8] sm:$0xff]  }
  0xdc   : > { %756 = vmatpush1.bf16.msra.mxu0 %v2003_v9  ;;  %v2042_v9 = vld [vmem:[#allocation9 + $0xe0] sm:$0xff]  }
  0xdd   : > { %757 = vmatprep.subr.bf16.mxu0 %v2008_v10  ;;  %v2043_v10 = vld [vmem:[#allocation9 + $0xa0] sm:$0xff]  }
  0xe0   : > { %758 = vmatpush1.bf16.msra.mxu0 %v2006_v11  ;;  %v2044_v11 = vld [vmem:[#allocation9 + $0xe8] sm:$0xff]  }
  0xe1   : > { %759 = vmatprep.subr.bf16.mxu0 %v2011_v12  ;;  %v2046_v12 = vld [vmem:[#allocation9 + $0xf0] sm:$0xff]  }
  0xe4   : > { %760 = vmatpush1.bf16.msra.mxu0 %v2009_v13  ;;  %v2047_v13 = vld [vmem:[#allocation9 + $0xb0] sm:$0xff]  }
  0xe5   : > { %761 = vmatprep.subr.bf16.mxu0 %v2014_v14  ;;  %v2048_v14 = vld [vmem:[#allocation9 + $0xf8] sm:$0xff]  }
  0xe8   : > { %762 = vmatpush1.bf16.msra.mxu0 %v2012_v15  ;;  %v2049_v15 = vld [vmem:[#allocation9 + $0xb8] sm:$0xff]  }
  0xe9   : > { %763 = vmatprep.subr.bf16.mxu0 %v2017_v16  ;;  %v2050_v16 = vld [vmem:[#allocation9 + $0x140] sm:$0xff]  }
  0xec   : > { %764 = vmatpush1.bf16.msra.mxu0 %v2015_v17  ;;  %v2051_v17 = vld [vmem:[#allocation9 + $0x100] sm:$0xff]  }
  0xef   : > { %1737 = vmatmul.mubr.msk.bf16.vlgmr.msra.gmra.mrb[0].mxu0 %vm2590_vm6, %v1736_v27  ;;  %v459_v27 = vrot.slane %v454_v25, %v458_v24  ;;  %v2059_v24 = vld [vmem:[#allocation9 + $0x120] sm:$0xff]   ;;  %v2060_v25 = vld [vmem:[#allocation9 + $0x168] sm:$0xff]  }
 0x1c2   : > { %v783_v29 = vpop.f32.mrb[0].mxu0 }
 0x1c3   : > { %v1849_v30 = vadd.f32 %v783_v29, %v459_v27  ;;  %v785_v31 = vpop.f32.mrb[1].mxu0  ;;  %v2064_v29 = vld [vmem:[#allocation9 + $0x178] sm:$0xff]  }
 0x1c4   : > { %v1850_v32 = vadd.f32 %v785_v31, %v463_v28  ;;  %v787_v33 = vpop.f32.mrb[2].mxu0  ;;  %v2066_v31 = vld [vmem:[#allocation10] sm:$0xff]  }
 0x1c5   : > { %v2604_v34 = vmax.f32 %v1849_v30, 0.0  ;;  %v1851_v35 = vadd.f32 %v787_v33, %v459_v27  ;;  %v789_v36 = vpop.f32.mrb[3].mxu0  ;;  %v2062_v27 = vld [vmem:[#allocation9 + $0x170] sm:$0xff]   ;;  %v2065_v30 = vld [vmem:[#allocation9 + $0x138] sm:$0xff]   ;;  %v2067_v33 = vld [vmem:[#allocation10 + $0x8] sm:$0xff]  }
 0x1c6   : > { %v793_v37 = vmax.f32 %v1850_v32, 0.0  ;;  %v1852_v38 = vadd.f32 %v789_v36, %v463_v28  ;;  %v2063_v28 = vld [vmem:[#allocation9 + $0x130] sm:$0xff]   ;;  %v2278_v32 = vmov 0.0   ;;  %v2070_v36 = vld [vmem:[#allocation10 + $0x20] sm:$0xff]  }
 0x1c7   : > { %v794_v39 = vmax.f32 %v1851_v35, 0.0  ;;  %v796_v40 = vrot.slane %v2604_v34, 7  ;;  %v808_v41 = vrot.slane %v2604_v34, 1  ;;  %1829 = vmatprep.subr.bf16.mxu0 %v2278_v32  ;;  %v2069_v35 = vld [vmem:[#allocation10 + $0x18] sm:$0xff]   ;;  %1845 = vmatprep.mubr.msk.bf16.mxu0 %vm2279_vm7, %v2278_v32 }
 0x1c8   : > { %v795_v42 = vmax.f32 %v1852_v38, 0.0  ;;  %v797_v43 = vrot.slane %v793_v37, 7  ;;  %v809_v47 = vrot.slane %v793_v37, 1  ;;  %1830 = vmatpush3.bf16.msra.mxu0 %v2066_v31  ;;  %v2073_v38 = vld [vmem:[#allocation10 + $0x38] sm:$0xff]  }
 0x1c9   : > { %v798_v44 = vrot.slane %v794_v39, 7  ;;  %v810_v45 = vrot.slane %v794_v39, 1  ;;  %v824_v46 = vpack.c.bf16 %v794_v39, %v2604_v34  ;;  %1831 = vmatprep.subr.bf16.mxu0 %v2278_v32  ;;  %v2068_v34 = vld [vmem:[#allocation10 + $0x10] sm:$0xff]  }
 0x1ca   : > { %v799_v48 = vrot.slane %v795_v42, 7  ;;  %v811_v49 = vrot.slane %v795_v42, 1  ;;  %v825_v50 = vpack.c.bf16 %v795_v42, %v793_v37  ;;  %v2071_v37 = vld [vmem:[#allocation10 + $0x28] sm:$0xff]  }
 0x1cb   : > { %v2611_v51 = vsel %vm388_vm0, %v808_v41, %v810_v45  ;;  %v2615_v52 = vsel %vm388_vm0, %v810_v45, %v808_v41  ;;  %v800_v53 = vsel %vm377_vm2, %v796_v40, %v798_v44  ;;  %v802_v54 = vsel %vm377_vm2, %v798_v44, %v796_v40  ;;  %v1656_v45 = vld [vmem:[%s2703_s4] ss:$0 sm:$0xff] }
 0x1cc   : > { %v1752_v55 = vpack.c.bf16 %v2615_v52, %v2611_v51  ;;  %v801_v56 = vsel %vm377_vm2, %v797_v43, %v799_v48  ;;  %v803_v58 = vsel %vm377_vm2, %v799_v48, %v797_v43  ;;  %v1744_v59 = vpack.c.bf16 %v800_v53, %v802_v54  ;;  %1832 = vmatpush3.bf16.msra.mxu0 %v2067_v33 }
 0x1cd   : > { %v1740_v60 = vpack.c.bf16 %v801_v56, %v803_v58  ;;  %v813_v62 = vsel %vm388_vm0, %v809_v47, %v811_v49  ;;  %v815_v63 = vsel %vm388_vm0, %v811_v49, %v809_v47  ;;  %1833 = vmatprep.subr.bf16.mxu0 %v2278_v32 }
 0x1ce   : > { %v1748_v3 = vpack.c.bf16 %v815_v63, %v813_v62 }
 0x1cf   : > { %1741 = vmatprep.mubr.msk.bf16.mxu1 %vm2577_vm4, %v1740_v60 }
 0x1d0   : > { %1745 = vmatmul.mubr.msk.bf16.vlgmr.msra.gmra.mrb[0].mxu1 %vm2577_vm4, %v1744_v59  ;;  %1834 = vmatpush3.bf16.msra.mxu0 %v2068_v34 }
 0x1d1   : > { %1777 = vmatpush3.bf16.msra.mxu1 %v2035_v61  ;;  %1302 = vmatprep.mubr.bf16.mxu1 %v825_v50 }
 0x1d2   : > { %1778 = vmatprep.subr.bf16.mxu1 %v2036_v0  ;;  %1835 = vmatprep.subr.bf16.mxu0 %v2278_v32 }
 0x1d4   : > { %1836 = vmatpush3.bf16.msra.mxu0 %v2069_v35 }
 0x1d5   : > { %1779 = vmatpush3.bf16.msra.mxu1 %v2037_v5  ;;  %1837 = vmatprep.subr.bf16.mxu0 %v2278_v32 }
 0x1d6   : > { %1780 = vmatprep.subr.bf16.mxu1 %v2038_v6 }
 0x1d8   : > { %1838 = vmatpush3.bf16.msra.mxu0 %v2070_v36 }
 0x1d9   : > { %1781 = vmatpush3.bf16.msra.mxu1 %v2039_v7  ;;  %1839 = vmatprep.subr.bf16.mxu0 %v2278_v32  ;;  %v1705_v7 = vld [vmem:[%s2705_s6] ss:$0 sm:$0xff] }
 0x1da   : > { %1782 = vmatprep.subr.bf16.mxu1 %v2040_v8 }
 0x1dc   : > { %1840 = vmatpush3.bf16.msra.mxu0 %v2071_v37 }
 0x1dd   : > { %1783 = vmatpush3.bf16.msra.mxu1 %v2041_v1  ;;  %1841 = vmatprep.subr.bf16.mxu0 %v2278_v32 }
 0x1de   : > { %1784 = vmatprep.subr.bf16.mxu1 %v2042_v9 }
 0x1e0   : > { %1842 = vmatpush3.bf16.msra.mxu0 %v2072_v18 }
 0x1e1   : > { %1785 = vmatpush3.bf16.msra.mxu1 %v2043_v10  ;;  %1843 = vmatprep.subr.bf16.mxu0 %v2278_v32 }
 0x1e2   : > { %1786 = vmatprep.subr.bf16.mxu1 %v2044_v11 }
 0x1e4   : > { %1844 = vmatpush3.bf16.msra.mxu0 %v2073_v38 }
 0x1e5   : > { %1787 = vmatpush3.bf16.msra.mxu1 %v2045_v57 }
 0x1e6   : > { %1788 = vmatprep.subr.bf16.mxu1 %v2046_v12 }
 0x1e9   : > { %1789 = vmatpush3.bf16.msra.mxu1 %v2047_v13 }
 0x1ea   : > { %1790 = vmatprep.subr.bf16.mxu1 %v2048_v14 }
 0x1ed   : > { %1791 = vmatpush3.bf16.msra.mxu1 %v2049_v15 }
 0x1ee   : > { %1798 = vmatprep.subr.bf16.mxu1 %v2050_v16 }
 0x1f0   : > { %1303 = vmatmul.mubr.bf16.vlgmr.msra.gmra.mrb[4].mxu1 %v824_v46 }
 0x1f1   : > { %1799 = vmatpush3.bf16.msra.mxu1 %v2051_v17  ;;  %1749 = vmatprep.mubr.msk.bf16.mxu1 %vm2590_vm6, %v1748_v3 }
 0x1f2   : > { %1800 = vmatprep.subr.bf16.mxu1 %v2052_v19 }
 0x1f5   : > { %1801 = vmatpush3.bf16.msra.mxu1 %v2053_v20 }
 0x1f6   : > { %1802 = vmatprep.subr.bf16.mxu1 %v2054_v21 }
 0x1f9   : > { %1803 = vmatpush3.bf16.msra.mxu1 %v2055_v2 }
 0x1fa   : > { %1804 = vmatprep.subr.bf16.mxu1 %v2056_v4 }
 0x1fd   : > { %1805 = vmatpush3.bf16.msra.mxu1 %v2057_v22 }
 0x1fe   : > { %1806 = vmatprep.subr.bf16.mxu1 %v2058_v23 }
 0x201   : > { %1807 = vmatpush3.bf16.msra.mxu1 %v2059_v24 }
 0x202   : > { %1808 = vmatprep.subr.bf16.mxu1 %v2060_v25 }
 0x205   : > { %1809 = vmatpush3.bf16.msra.mxu1 %v2061_v26 }
 0x206   : > { %1810 = vmatprep.subr.bf16.mxu1 %v2062_v27 }
 0x209   : > { %1811 = vmatpush3.bf16.msra.mxu1 %v2063_v28 }
 0x20a   : > { %1812 = vmatprep.subr.bf16.mxu1 %v2064_v29 }
 0x20d   : > { %1813 = vmatpush3.bf16.msra.mxu1 %v2065_v30 }
 0x210   : > { %1753 = vmatmul.mubr.msk.bf16.vlgmr.msra.gmra.mrb[8].mxu1 %vm2590_vm6, %v1752_v55 }
 0x2a3   : > { %v1770_v39 = vpop.f32.mrb[0].mxu1 }
 0x2a4   : > { %v1771_v40 = vpop.f32.mrb[1].mxu1 }
 0x2a5   : > { %v1772_v41 = vadd.f32 %v1771_v40, %v1770_v39  ;;  %v1773_v42 = vpop.f32.mrb[2].mxu1 }
 0x2a6   : > { %v1774_v43 = vpop.f32.mrb[3].mxu1 }
 0x2a7   : > { %v1775_v44 = vadd.f32 %v1774_v43, %v1773_v42  ;;  %v1264_v48 = vadd.f32 %v1772_v41, %v1656_v45 }
 0x2a9   : > { %v1267_v52 = vadd.f32 %v1775_v44, %v1656_v45 }
 0x2c3   : > { %v1792_v46 = vpop.f32.mrb[4].mxu1 }
 0x2c4   : > { %v1793_v47 = vpop.f32.mrb[5].mxu1 }
 0x2c5   : > { %v1794_v49 = vadd.f32 %v1793_v47, %v1792_v46  ;;  %v1795_v50 = vpop.f32.mrb[6].mxu1 }
 0x2c6   : > { %v1796_v51 = vpop.f32.mrb[7].mxu1 }
 0x2c7   : > { %v1305_v53 = vadd.f32 %v1794_v49, %v1264_v48  ;;  %v1797_v54 = vadd.f32 %v1796_v51, %v1795_v50 }
 0x2c9   : > { %v1308_v55 = vadd.f32 %v1797_v54, %v1267_v52 }
 0x2e3   : > { %v1814_v56 = vpop.f32.mrb[8].mxu1 }
 0x2e4   : > { %v1815_v58 = vpop.f32.mrb[9].mxu1 }
 0x2e5   : > { %v1816_v59 = vadd.f32 %v1815_v58, %v1814_v56  ;;  %v1817_v60 = vpop.f32.mrb[10].mxu1 }
 0x2e6   : > { %v1818_v61 = vpop.f32.mrb[11].mxu1 }
 0x2e7   : > { %v1346_v62 = vadd.f32 %v1816_v59, %v1305_v53  ;;  %v1819_v63 = vadd.f32 %v1818_v61, %v1817_v60 }
 0x2e9   : > { %v1349_v0 = vadd.f32 %v1819_v63, %v1308_v55  ;;  %2074 = vtanh.f32 %v1346_v62 }
 0x2eb   : > { %2076 = vtanh.f32 %v1349_v0 }
 0x2f3   : > { %v2075_v3 = vpop.eup %2074 }
 0x2f5   : > { %v2077_v5 = vpop.eup %2076 }
 0x2f6   : > { %v1354_v6 = vpack.c.bf16 %v2077_v5, %v2075_v3 }
 0x2f8   : > { %1846 = vmatmul.mubr.bf16.vlgmr.msra.gmra.mrb[4].mxu0 %v1354_v6 }
 0x3cb   : > { %v1460_v8 = vpop.f32.mrb[4].mxu0 }
 0x3cc   : > { %v1847_v1 = vpop.f32.mrb[5].mxu0  ;;  %v1461_v10 = vadd.f32 %v1705_v7, %v1460_v8 }
 0x3cd   : > { %v1463_v9 = vpop.f32.mrb[6].mxu0 }
 0x3ce   : > { %v1464_v11 = vadd.f32 %v1705_v7, %v1463_v9  ;;  %v1848_v57 = vpop.f32.mrb[7].mxu0 }
 0x3d0   : > { %v1728_v12 = vpack.c.bf16 %v1464_v11, %v1461_v10 }
 0x3d2   : > { %1729 = vst [vmem:[%s340_s22] sm:$0xff] %v1728_v12  }
 0x3d3   : > { %2205 = shalt.err (!%p2202_p4)
}
 0x3d4   : > { %s2206_s13 = scalar_lea.hbm %s2655_s8, 128  ;;  %s2210_s14 = scalar_lea.hbm %s2706_s7, 256 }
 0x3d5   : > { %p2207_p9 = scmp.ne.s32.totalorder %s2655_s8, %s2206_s13  ;;  %p2211_p8 = scmp.lt.u32.totalorder %s2655_s8, %s2706_s7 }
 0x3d6   : > { %p2212_p13 = scmp.lt.u32.totalorder %s2210_s14, %s2206_s13  ;;  %p2214_p10 = scmp.lt.u32.totalorder %s2206_s13, %s2655_s8 }
 0x3d7   : > { %p2208_p0 = pnand %p2207_p9, %p2468_p5 }
 0x3d8   : > { %p2213_p6 = por %p2212_p13, %p2211_p8 }
 0x3d9   : > { %p2209_p11 = pneg %p2208_p0 }
 0x3da   : > { %p2215_p3 = por %p2214_p10, %p2213_p6 }
 0x3dc   : > { %p2216_p7 = pnand %p2215_p3, %p2209_p11 }
 0x3de   : > { %2219 = shalt.err (!%p2216_p7)
}
 0x3df   : > { %s2281_s15 = smov 64   ;;  %s2282_s29 = smov 4  }
 0x3e0   : > { %1871 = dma.vmem_to_hbm [thread:$0]  (%p2468_p5), %s2650_s23, 128, %s2655_s8, %s1478_s17, %s2281_s15, %s2281_s15, %s2282_s29  }
 0x3e1 PF: > { %s2738_s10 = sld [smem:[#allocation17_spill]]  ;;  %s1506_s18 = sand.u32 1, %s2254_s24  }
 0x3e2   : > { %p2740_p1 = scmp.ge.s32.totalorder %s2266_s27, 2  ;;  %s1507_s28 = scalar_lea.sflag [#allocation6], %s1506_s18 }
 0x3e7   : > { %p2739_p12 = scmp.ne.s32.totalorder %s2738_s10, 0 }
 0x3e9   : > { %p1888_p2 = pnand %p2740_p1, %p2739_p12 }
 0x3eb   : > { %2249 = dma.done.wait (!%p1888_p2), %s1507_s28, 128  }
 0x3ec   : > { %2251 = vsyncadd (!%p1888_p2), %s1507_s28, 4294967168  ;;  %p22_p4 = scmp.ge.s32.totalorder %s2436_s21, 4   ;;  %s2741_s24 = smov %s2258_s25 }
 0x3ed   : > { %s2742_s25 = smov %s2262_s26  ;;  %s2743_s26 = smov %s2464_s12 }
 0x3ee   : > { %s2744_s27 = smov %s2436_s21  ;;  %24 = sbr.rel (!%p22_p4) target bundleno = 9 (0x9), region = 105 }
 0x3f5   :  { %1512 = vsyncpa [#allocation5], 1 }
 0x3f6   :  { %1514 = vsyncpa [#allocation5 + $0x1], 1 }
 0x3f7   :  { %1515 = vsyncpa [#allocation8], 1 }
 0x3f8   :  { %1516 = vsyncpa [#allocation11], 1 }
 0x3f9   :  { %1517 = vsyncpa [#allocation6], 1 }
 0x3fa   :  { %1519 = vsyncpa [#allocation6 + $0x1], 1 }

</bundles_post_ra>
